<compile_context>
chip_gen: v7x
topology: tpu7x:2x2x1
jax: 0.10.0
libtpu: 0.0.40
codegen_flags: <defaults>
</compile_context>

<pallas_src>
import math

import jax
import jax.numpy as jnp
import numpy as np
from jax.experimental import pallas as pl
from jax.experimental.pallas import tpu as pltpu


def _add_pe_kernel(x_ref, pe_ref, o_ref):
    # x_ref: (TB, R, 128) or (1, TR, 128); pe_ref: (1, R, 128) or (1, TR, 128).
    # pe broadcasts over the leading (batch) block dim; cast to the output dtype
    # happens here, at the store.
    o_ref[...] = (x_ref[...] + pe_ref[...]).astype(o_ref.dtype)


def _sublane_pack(dtype):
    # rows per packed vreg tile: 8 for 4-byte, 16 for 2-byte, 32 for 1-byte dtypes.
    return 8 * max(1, 4 // jnp.dtype(dtype).itemsize)


def position_embed_pallas(x, pe):
    """Pallas TPU implementation of HiT PositionEmbed: x + pe (pe broadcast over batch)."""
    B = x.shape[0]
    rest = x.shape[1:]

    # Accept pe given either as x.shape[1:] or with a leading broadcast dim of 1.
    if pe.ndim == x.ndim:
        assert pe.shape[0] == 1, "pe may only broadcast over the batch dim"
        pe = jnp.squeeze(pe, axis=0)
    if pe.shape != rest:
        pe = jnp.broadcast_to(pe, rest)
    # NOTE: no dtype cast here -- pe is loaded natively and cast inside the kernel.

    out_dtype = jnp.promote_types(x.dtype, pe.dtype)

    # Lane-dense layout: flatten non-batch dims, pad up to a multiple of 128.
    m = math.prod(rest)
    m_pad = ((m + 127) // 128) * 128
    R = m_pad // 128
    x2 = x.reshape(B, m)
    pe2 = pe.reshape(1, m)
    if m_pad != m:
        x2 = jnp.pad(x2, ((0, 0), (0, m_pad - m)))
        pe2 = jnp.pad(pe2, ((0, 0), (0, m_pad - m)))
    x3 = x2.reshape(B, R, 128)
    pe3 = pe2.reshape(1, R, 128)

    # Tile sizing: ~1 MiB per x/out block -> ~5-6 MiB live VMEM total (safe on
    # v5e/v6e/v7x without touching vmem_limit_bytes).
    itemsize = max(jnp.dtype(x.dtype).itemsize,
                   jnp.dtype(pe.dtype).itemsize,
                   jnp.dtype(out_dtype).itemsize)
    pack = _sublane_pack(x.dtype)
    target_rows = max(pack, ((1 << 20) // (128 * itemsize)) // pack * pack)

    if R >= target_rows:
        # Large per-sample slab: tile rows; batch is the innermost grid axis so pe's
        # block (constant in b) stays VMEM-resident across it -> one pe DMA per row tile.
        TR = target_rows
        grid = (pl.cdiv(R, TR), B)
        x_block, x_map = (1, TR, 128), (lambda rt, b: (b, rt, 0))
        pe_block, pe_map = (1, TR, 128), (lambda rt, b: (0, rt, 0))
        dims = ("parallel", "parallel")
    else:
        # Small per-sample slab: fold batch into the block so each grid step still
        # moves ~1 MiB; whole pe stays resident (block index fixed at (0,0,0)).
        TB = max(1, min(B, target_rows // max(R, 1)))
        grid = (pl.cdiv(B, TB),)
        x_block, x_map = (TB, R, 128), (lambda bt: (bt, 0, 0))
        pe_block, pe_map = (1, R, 128), (lambda bt: (0, 0, 0))
        dims = ("parallel",)

    cost = pl.CostEstimate(
        flops=B * m,
        transcendentals=0,
        bytes_accessed=(B * m * (jnp.dtype(x.dtype).itemsize
                                 + jnp.dtype(out_dtype).itemsize)
                        + m * jnp.dtype(pe.dtype).itemsize),
    )

    def build(pe_single_buffered):
        if pe_single_buffered:
            pe_spec = pl.BlockSpec(pe_block, pe_map, pipeline_mode=pl.Buffered(1))
        else:
            pe_spec = pl.BlockSpec(pe_block, pe_map)
        return pl.pallas_call(
            _add_pe_kernel,
            out_shape=jax.ShapeDtypeStruct((B, R, 128), out_dtype),
            grid_spec=pltpu.PrefetchScalarGridSpec(
                num_scalar_prefetch=0,
                grid=grid,
                in_specs=[pl.BlockSpec(x_block, x_map), pe_spec],
                out_specs=pl.BlockSpec(x_block, x_map),
            ),
            compiler_params=pltpu.CompilerParams(dimension_semantics=dims),
            cost_estimate=cost,
        )

    try:
        # pe's block index never changes within the inner loop, so single-buffer it
        # (halves its VMEM footprint; double buffering buys nothing).
        out3 = build(pe_single_buffered=True)(x3, pe3)
    except Exception:
        # Fallback if this jax build rejects pipeline_mode on a pallas_call BlockSpec:
        # default (double) buffering is functionally identical, just uses a bit more VMEM.
        out3 = build(pe_single_buffered=False)(x3, pe3)

    out = out3.reshape(B, m_pad)
    if m_pad != m:
        out = out[:, :m]
    return out.reshape(x.shape)


if __name__ == "__main__":
    # Small shapes consistent with the module: x (B, C, H, W), pe (C, H, W).
    B, C, H, W = 2, 4, 16, 16
    key = jax.random.PRNGKey(0)
    kx, kp = jax.random.split(key)
    x = jax.random.normal(kx, (B, C, H, W), dtype=jnp.float32)
    # The torch parameter is zero-initialized; use random values here so the
    # check actually exercises the addition and the broadcast.
    pe = 0.02 * jax.random.normal(kp, (C, H, W), dtype=jnp.float32)

    out = position_embed_pallas(x, pe)
    out = jax.block_until_ready(out)

    ref = x + pe  # PyTorch forward: x + self.pe (broadcast over batch)
    assert out.shape == x.shape and out.dtype == ref.dtype
    np.testing.assert_allclose(np.asarray(out), np.asarray(ref), rtol=0, atol=0)

    print("KERNEL_OK")
</pallas_src>

<mosaic_0001>
module attributes {stable_mosaic.version = 11 : i64} {
  func.func @_add_pe_kernel(%arg0: i32, %arg1: memref<2x8x128xf32, #tpu.memory_space<vmem>>, %arg2: memref<1x8x128xf32, #tpu.memory_space<vmem>>, %arg3: memref<2x8x128xf32, #tpu.memory_space<vmem>>) attributes {dimension_semantics = [#tpu.dimension_semantics<parallel>], iteration_bounds = array<i64: 1>, scalar_prefetch = 0 : i64, scratch_operands = 0 : i64, tpu.core_type = #tpu.core_type<tc>, window_params = [{transform_indices = @transform_0, window_bounds = array<i64: 2, 8, 128>}, {pipeline_mode = #tpu.pipeline_mode<synchronous>, transform_indices = @transform_1, window_bounds = array<i64: 1, 8, 128>}, {transform_indices = @transform_2, window_bounds = array<i64: 2, 8, 128>}]} {
    %c0 = arith.constant 0 : index
    %c0_0 = arith.constant 0 : index
    %c0_1 = arith.constant 0 : index
    %0 = vector.load %arg1[%c0, %c0_0, %c0_1] : memref<2x8x128xf32, #tpu.memory_space<vmem>>, vector<2x8x128xf32>
    %c0_2 = arith.constant 0 : index
    %c0_3 = arith.constant 0 : index
    %c0_4 = arith.constant 0 : index
    %1 = vector.load %arg2[%c0_2, %c0_3, %c0_4] : memref<1x8x128xf32, #tpu.memory_space<vmem>>, vector<1x8x128xf32>
    %2 = vector.broadcast %1 : vector<1x8x128xf32> to vector<2x8x128xf32>
    %3 = arith.addf %0, %2 : vector<2x8x128xf32>
    %c0_5 = arith.constant 0 : index
    %c0_6 = arith.constant 0 : index
    %c0_7 = arith.constant 0 : index
    %4 = vector.load %arg3[%c0_5, %c0_6, %c0_7] : memref<2x8x128xf32, #tpu.memory_space<vmem>>, vector<2x8x128xf32>
    tpu.vector_store %arg3[%c0_5, %c0_6, %c0_7], %3 {strides = array<i32>} : memref<2x8x128xf32, #tpu.memory_space<vmem>>, vector<2x8x128xf32>,
    return
  }
  func.func @transform_0(%arg0: i32) -> (i32, i32, i32) {
    %c0_i32 = arith.constant 0 : i32
    %c0_i32_0 = arith.constant 0 : i32
    %c0_i32_1 = arith.constant 0 : i32
    return %arg0, %c0_i32, %c0_i32_0 : i32, i32, i32
  }
  func.func @transform_1(%arg0: i32) -> (i32, i32, i32) {
    %c0_i32 = arith.constant 0 : i32
    %c0_i32_0 = arith.constant 0 : i32
    %c0_i32_1 = arith.constant 0 : i32
    %c0_i32_2 = arith.constant 0 : i32
    return %c0_i32, %c0_i32_0, %c0_i32_1 : i32, i32, i32
  }
  func.func @transform_2(%arg0: i32) -> (i32, i32, i32) {
    %c0_i32 = arith.constant 0 : i32
    %c0_i32_0 = arith.constant 0 : i32
    %c0_i32_1 = arith.constant 0 : i32
    return %arg0, %c0_i32, %c0_i32_0 : i32, i32, i32
  }
}

module attributes {stable_mosaic.version = 11 : i64} {
  func.func @_add_pe_kernel(%arg0: i32, %arg1: memref<2x8x128xf32, #tpu.memory_space<vmem>>, %arg2: memref<1x8x128xf32, #tpu.memory_space<vmem>>, %arg3: memref<2x8x128xf32, #tpu.memory_space<vmem>>) attributes {dimension_semantics = [#tpu.dimension_semantics<parallel>], iteration_bounds = array<i64: 1>, scalar_prefetch = 0 : i64, scratch_operands = 0 : i64, tpu.core_type = #tpu.core_type<tc>, window_params = [{transform_indices = @transform_0, window_bounds = array<i64: 2, 8, 128>}, {pipeline_mode = #tpu.pipeline_mode<synchronous>, transform_indices = @transform_1, window_bounds = array<i64: 1, 8, 128>}, {transform_indices = @transform_2, window_bounds = array<i64: 2, 8, 128>}]} {
    %c0 = arith.constant 0 : index
    %c0_0 = arith.constant 0 : index
    %c0_1 = arith.constant 0 : index
    %0 = vector.load %arg1[%c0, %c0_0, %c0_1] : memref<2x8x128xf32, #tpu.memory_space<vmem>>, vector<2x8x128xf32>
    %c0_2 = arith.constant 0 : index
    %c0_3 = arith.constant 0 : index
    %c0_4 = arith.constant 0 : index
    %1 = vector.load %arg2[%c0_2, %c0_3, %c0_4] : memref<1x8x128xf32, #tpu.memory_space<vmem>>, vector<1x8x128xf32>
    %2 = vector.broadcast %1 : vector<1x8x128xf32> to vector<2x8x128xf32>
    %3 = arith.addf %0, %2 : vector<2x8x128xf32>
    %c0_5 = arith.constant 0 : index
    %c0_6 = arith.constant 0 : index
    %c0_7 = arith.constant 0 : index
    %4 = vector.load %arg3[%c0_5, %c0_6, %c0_7] : memref<2x8x128xf32, #tpu.memory_space<vmem>>, vector<2x8x128xf32>
    tpu.vector_store %arg3[%c0_5, %c0_6, %c0_7], %3 {strides = array<i32>} : memref<2x8x128xf32, #tpu.memory_space<vmem>>, vector<2x8x128xf32>,
    return
  }
  func.func @transform_0(%arg0: i32) -> (i32, i32, i32) {
    %c0_i32 = arith.constant 0 : i32
    %c0_i32_0 = arith.constant 0 : i32
    %c0_i32_1 = arith.constant 0 : i32
    return %arg0, %c0_i32, %c0_i32_0 : i32, i32, i32
  }
  func.func @transform_1(%arg0: i32) -> (i32, i32, i32) {
    %c0_i32 = arith.constant 0 : i32
    %c0_i32_0 = arith.constant 0 : i32
    %c0_i32_1 = arith.constant 0 : i32
    %c0_i32_2 = arith.constant 0 : i32
    return %c0_i32, %c0_i32_0, %c0_i32_1 : i32, i32, i32
  }
  func.func @transform_2(%arg0: i32) -> (i32, i32, i32) {
    %c0_i32 = arith.constant 0 : i32
    %c0_i32_0 = arith.constant 0 : i32
    %c0_i32_1 = arith.constant 0 : i32
    return %arg0, %c0_i32, %c0_i32_0 : i32, i32, i32
  }
}

</mosaic_0001>

<bundles_post_ra>
// kernel: tpu_custom_call.1
= control target key start
LH: loop header
LB: loop body
LE: loop exit
PB: predicated region body
PF: predicated region fallthrough
CT: control target
= control target key end

     0   :  { %7 = vsyncpa [#allocation3], 0  ;;  %s202_s0 = inlined_call_operand.hbm [shape: f32[2,8,128], index: 0, kind: input, shape index: {}]   ;;  %s203_s1 = inlined_call_operand.hbm [shape: f32[1,8,128], index: 1, kind: input, shape index: {}]   ;;  %s204_s2 = inlined_call_operand.hbm [shape: f32[2,8,128], index: 2, kind: output, shape index: {}]  }
   0x1   :  { %8 = vsyncpa [#allocation6], 0 }
   0x2   :  { %9 = vsyncpa [#allocation4], 0  ;;  %s140_s9 = smov [#allocation2]   ;;  %s68_s13 = scalar_lea.hbm %s202_s0, 256 }
   0x3   :  { %s15_s10 = sshll.u32 %s140_s9, 4  ;;  %p69_p0 = scmp.ne.s32.totalorder %s202_s0, %s68_s13  ;;  %s16_s10 = int_to_ptr.vmem [resolvable:$true] %s15_s10 }
   0x4   :  { %p72_p1 = scmp.lt.u32.totalorder %s68_s13, %s202_s0 }
   0x6   :  { %p74_p2 = pnand %p72_p1, %p69_p0 }
   0x8   :  { %77 = shalt.err (!%p74_p2)
}
   0x9   :  { %s78_s18 = scalar_lea.vmem %s16_s10, 256  ;;  %p83_p4 = scmp.lt.s32.totalorder %s16_s10, %s16_s10 }
   0xa   :  { %p79_p3 = scmp.ne.s32.totalorder %s16_s10, %s78_s18  ;;  %p84_p5 = scmp.lt.s32.totalorder %s78_s18, %s78_s18 }
   0xc   :  { %p85_p6 = por %p84_p5, %p83_p4 }
   0xe   :  { %p86_p7 = pnand %p85_p6, %p79_p3 }
  0x10   :  { %89 = shalt.err (!%p86_p7)
}
  0x11   :  { %s141_s19 = smov 128   ;;  %s142_s20 = smov 8  }
  0x12   :  { %21 = dma.hbm_to_vmem [thread:$0]  %s202_s0, 256, %s16_s10, [#allocation3], %s141_s19, %s141_s19, %s142_s20  }
  0x13   :  { %s143_s23 = smov [#allocation5]   ;;  %s90_s27 = scalar_lea.hbm %s203_s1, 128 }
  0x14   :  { %s28_s24 = sshll.u32 %s143_s23, 4  ;;  %p91_p8 = scmp.ne.s32.totalorder %s203_s1, %s90_s27  ;;  %s29_s24 = int_to_ptr.vmem [resolvable:$true] %s28_s24 }
  0x15   :  { %p94_p9 = scmp.lt.u32.totalorder %s90_s27, %s203_s1 }
  0x17   :  { %p96_p10 = pnand %p94_p9, %p91_p8 }
  0x19   :  { %99 = shalt.err (!%p96_p10)
}
  0x1a   :  { %s100_s4 = scalar_lea.vmem %s29_s24, 128  ;;  %p105_p12 = scmp.lt.s32.totalorder %s29_s24, %s29_s24 }
  0x1b   :  { %p101_p11 = scmp.ne.s32.totalorder %s29_s24, %s100_s4  ;;  %p106_p13 = scmp.lt.s32.totalorder %s100_s4, %s100_s4 }
  0x1d   :  { %p107_p0 = por %p106_p13, %p105_p12 }
  0x1f   :  { %p108_p1 = pnand %p107_p0, %p101_p11 }
  0x21   :  { %111 = shalt.err (!%p108_p1)
}
  0x22   :  { %31 = dma.hbm_to_vmem [thread:$0]  %s203_s1, 128, %s29_s24, [#allocation6]  }
  0x23   :  { %134 = dma.done.wait [#allocation3], 256  }
  0x24   :  { %135 = vsyncadd [#allocation3], 4294967040 }
  0x25   :  { %136 = dma.done.wait [#allocation6], 128  }
  0x26   :  { %137 = vsyncadd [#allocation6], 4294967168  ;;  %s144_s6 = smov [#allocation7]   ;;  %v38_v0 = vld [vmem:[#allocation2] sm:$0xff]  ;;  %v40_v1 = vld [vmem:[#allocation5] sm:$0xff] }
  0x27   :  { %s50_s7 = sshll.u32 %s144_s6, 4  ;;  %v39_v2 = vld [vmem:[#allocation2 + $0x8] sm:$0xff]  ;;  %v41_v3 = vadd.f32 %v40_v1, %v38_v0  ;;  %s51_s7 = int_to_ptr.vmem [resolvable:$true] %s50_s7 }
  0x28   :  { %v42_v4 = vadd.f32 %v40_v1, %v39_v2  ;;  %s112_s8 = scalar_lea.vmem %s51_s7, 256  ;;  %p117_p3 = scmp.lt.s32.totalorder %s51_s7, %s51_s7 }
  0x29   :  { %43 = vst [vmem:[#allocation7] sm:$0xff] %v41_v3  ;;  %p113_p2 = scmp.ne.s32.totalorder %s51_s7, %s112_s8  ;;  %p118_p4 = scmp.lt.s32.totalorder %s112_s8, %s112_s8 }
  0x2a   :  { %44 = vst [vmem:[#allocation7 + $0x8] sm:$0xff] %v42_v4 }
  0x2b   :  { %p119_p5 = por %p118_p4, %p117_p3 }
  0x2d   :  { %p120_p6 = pnand %p119_p5, %p113_p2 }
  0x2f   :  { %123 = shalt.err (!%p120_p6)
}
  0x30   :  { %s124_s10 = scalar_lea.hbm %s204_s2, 256 }
  0x31   :  { %p125_p7 = scmp.ne.s32.totalorder %s204_s2, %s124_s10  ;;  %p128_p8 = scmp.lt.u32.totalorder %s124_s10, %s204_s2 }
  0x33   :  { %p130_p9 = pnand %p128_p8, %p125_p7 }
  0x35   :  { %133 = shalt.err (!%p130_p9)
}
  0x36   :  { %56 = dma.vmem_to_hbm [thread:$0]  %s51_s7, 256, %s204_s2, [#allocation4], %s141_s19, %s141_s19, %s142_s20  }
  0x37   :  { %138 = dma.done.wait [#allocation4], 256  }
  0x38   :  { %139 = vsyncadd [#allocation4], 4294967040 }
  0x39   :  { %60 = vsyncpa [#allocation3], 1 }
  0x3a   :  { %61 = vsyncpa [#allocation6], 1 }
  0x3b   :  { %62 = vsyncpa [#allocation4], 1 }

// kernel: tpu_custom_call.1
= control target key start
LH: loop header
LB: loop body
LE: loop exit
PB: predicated region body
PF: predicated region fallthrough
CT: control target
= control target key end

     0   :  { %7 = vsyncpa [#allocation3], 0  ;;  %s202_s0 = inlined_call_operand.hbm [shape: f32[2,8,128], index: 0, kind: input, shape index: {}]   ;;  %s203_s1 = inlined_call_operand.hbm [shape: f32[1,8,128], index: 1, kind: input, shape index: {}]   ;;  %s204_s2 = inlined_call_operand.hbm [shape: f32[2,8,128], index: 2, kind: output, shape index: {}]  }
   0x1   :  { %8 = vsyncpa [#allocation6], 0 }
   0x2   :  { %9 = vsyncpa [#allocation4], 0  ;;  %s140_s9 = smov [#allocation2]   ;;  %s68_s13 = scalar_lea.hbm %s202_s0, 256 }
   0x3   :  { %s15_s10 = sshll.u32 %s140_s9, 4  ;;  %p69_p0 = scmp.ne.s32.totalorder %s202_s0, %s68_s13  ;;  %s16_s10 = int_to_ptr.vmem [resolvable:$true] %s15_s10 }
   0x4   :  { %p72_p1 = scmp.lt.u32.totalorder %s68_s13, %s202_s0 }
   0x6   :  { %p74_p2 = pnand %p72_p1, %p69_p0 }
   0x8   :  { %77 = shalt.err (!%p74_p2)
}
   0x9   :  { %s78_s18 = scalar_lea.vmem %s16_s10, 256  ;;  %p83_p4 = scmp.lt.s32.totalorder %s16_s10, %s16_s10 }
   0xa   :  { %p79_p3 = scmp.ne.s32.totalorder %s16_s10, %s78_s18  ;;  %p84_p5 = scmp.lt.s32.totalorder %s78_s18, %s78_s18 }
   0xc   :  { %p85_p6 = por %p84_p5, %p83_p4 }
   0xe   :  { %p86_p7 = pnand %p85_p6, %p79_p3 }
  0x10   :  { %89 = shalt.err (!%p86_p7)
}
  0x11   :  { %s141_s19 = smov 128   ;;  %s142_s20 = smov 8  }
  0x12   :  { %21 = dma.hbm_to_vmem [thread:$0]  %s202_s0, 256, %s16_s10, [#allocation3], %s141_s19, %s141_s19, %s142_s20  }
  0x13   :  { %s143_s23 = smov [#allocation5]   ;;  %s90_s27 = scalar_lea.hbm %s203_s1, 128 }
  0x14   :  { %s28_s24 = sshll.u32 %s143_s23, 4  ;;  %p91_p8 = scmp.ne.s32.totalorder %s203_s1, %s90_s27  ;;  %s29_s24 = int_to_ptr.vmem [resolvable:$true] %s28_s24 }
  0x15   :  { %p94_p9 = scmp.lt.u32.totalorder %s90_s27, %s203_s1 }
  0x17   :  { %p96_p10 = pnand %p94_p9, %p91_p8 }
  0x19   :  { %99 = shalt.err (!%p96_p10)
}
  0x1a   :  { %s100_s4 = scalar_lea.vmem %s29_s24, 128  ;;  %p105_p12 = scmp.lt.s32.totalorder %s29_s24, %s29_s24 }
  0x1b   :  { %p101_p11 = scmp.ne.s32.totalorder %s29_s24, %s100_s4  ;;  %p106_p13 = scmp.lt.s32.totalorder %s100_s4, %s100_s4 }
  0x1d   :  { %p107_p0 = por %p106_p13, %p105_p12 }
  0x1f   :  { %p108_p1 = pnand %p107_p0, %p101_p11 }
  0x21   :  { %111 = shalt.err (!%p108_p1)
}
  0x22   :  { %31 = dma.hbm_to_vmem [thread:$0]  %s203_s1, 128, %s29_s24, [#allocation6]  }
  0x23   :  { %134 = dma.done.wait [#allocation3], 256  }
  0x24   :  { %135 = vsyncadd [#allocation3], 4294967040 }
  0x25   :  { %136 = dma.done.wait [#allocation6], 128  }
  0x26   :  { %137 = vsyncadd [#allocation6], 4294967168  ;;  %s144_s6 = smov [#allocation7]   ;;  %v38_v0 = vld [vmem:[#allocation2] sm:$0xff]  ;;  %v40_v1 = vld [vmem:[#allocation5] sm:$0xff] }
  0x27   :  { %s50_s7 = sshll.u32 %s144_s6, 4  ;;  %v39_v2 = vld [vmem:[#allocation2 + $0x8] sm:$0xff]  ;;  %v41_v3 = vadd.f32 %v40_v1, %v38_v0  ;;  %s51_s7 = int_to_ptr.vmem [resolvable:$true] %s50_s7 }
  0x28   :  { %v42_v4 = vadd.f32 %v40_v1, %v39_v2  ;;  %s112_s8 = scalar_lea.vmem %s51_s7, 256  ;;  %p117_p3 = scmp.lt.s32.totalorder %s51_s7, %s51_s7 }
  0x29   :  { %43 = vst [vmem:[#allocation7] sm:$0xff] %v41_v3  ;;  %p113_p2 = scmp.ne.s32.totalorder %s51_s7, %s112_s8  ;;  %p118_p4 = scmp.lt.s32.totalorder %s112_s8, %s112_s8 }
  0x2a   :  { %44 = vst [vmem:[#allocation7 + $0x8] sm:$0xff] %v42_v4 }
  0x2b   :  { %p119_p5 = por %p118_p4, %p117_p3 }
  0x2d   :  { %p120_p6 = pnand %p119_p5, %p113_p2 }
  0x2f   :  { %123 = shalt.err (!%p120_p6)
}
  0x30   :  { %s124_s10 = scalar_lea.hbm %s204_s2, 256 }
  0x31   :  { %p125_p7 = scmp.ne.s32.totalorder %s204_s2, %s124_s10  ;;  %p128_p8 = scmp.lt.u32.totalorder %s124_s10, %s204_s2 }
  0x33   :  { %p130_p9 = pnand %p128_p8, %p125_p7 }
  0x35   :  { %133 = shalt.err (!%p130_p9)
}
  0x36   :  { %56 = dma.vmem_to_hbm [thread:$0]  %s51_s7, 256, %s204_s2, [#allocation4], %s141_s19, %s141_s19, %s142_s20  }
  0x37   :  { %138 = dma.done.wait [#allocation4], 256  }
  0x38   :  { %139 = vsyncadd [#allocation4], 4294967040 }
  0x39   :  { %60 = vsyncpa [#allocation3], 1 }
  0x3a   :  { %61 = vsyncpa [#allocation6], 1 }
  0x3b   :  { %62 = vsyncpa [#allocation4], 1 }

</bundles_post_ra>
